<compile_context>
chip_gen: v5e
topology: v5e:2x2
jax: 0.10.0
libtpu: 0.0.40
codegen_flags: <defaults>
</compile_context>

<pallas_src>
import functools
import math

import jax
import jax.numpy as jnp
from jax import lax
from jax.experimental import pallas as pl
from jax.experimental.pallas import tpu as pltpu

# Module defaults: node_dim=128, projection_dim=8, activation='silu',
# layer_norm=True, num_residuals=3, pre_residual has n_layers=2.
NODE_DIM = 128
PROJ_DIM = 8
NUM_RES = 3
PRE_LAYERS = 2
RES_LAYERS = 2
LN_EPS = 1e-5


def _silu(v):
    # v * sigmoid(v) == 0.5 * v * (tanh(0.5*v) + 1): single EUP tanh instead of exp+recip.
    return 0.5 * v * (jnp.tanh(0.5 * v) + 1.0)


def _lane_tile(x, reps):
    """jnp.tile(x, (1, reps)) via lane-axis concatenation (Mosaic-friendly)."""
    if reps == 1:
        return x
    return jnp.concatenate([x] * reps, axis=1)


def _masked_fourier(fourier, batch_col, lane_bid, b_slots):
    """rim[:, b*2K + j] = fourier[:, j] * [batch == b]   ->  [TN, b_slots*2K] f32."""
    tiled = _lane_tile(fourier, b_slots)            # [TN, L]
    mask = lane_bid == batch_col                    # [1,L] vs [TN,1] -> [TN,L] bool
    return jnp.where(mask, tiled, 0.0)


# ----------------------------- pass 1: structure factors -----------------------------
def _sf_kernel(x_ref, fourier_ref, batch_ref, lane_bid_ref,
               w_pre_ref, b_pre_ref, ln_g_ref, ln_b_ref,
               sf_ref, *, b_slots, compute_dtype):
    @pl.when(pl.program_id(1) == 0)
    def _():
        sf_ref[...] = jnp.zeros_like(sf_ref)

    x = x_ref[...]                                   # [TN, D] f32

    # pre_residual: x + (Linear + SiLU) * 2   (matmul operands in compute_dtype)
    h = x
    for l in range(PRE_LAYERS):
        h = _silu(jnp.dot(h.astype(compute_dtype), w_pre_ref[l, :, :],
                          preferred_element_type=jnp.float32) + b_pre_ref[l, :, :])
    node_res = x + h

    # LayerNorm over node_dim (f32)
    mean = jnp.mean(node_res, axis=-1, keepdims=True)
    var = jnp.mean(jnp.square(node_res - mean), axis=-1, keepdims=True)
    node_res = (node_res - mean) * lax.rsqrt(var + LN_EPS) * ln_g_ref[...] + ln_b_ref[...]

    rim = _masked_fourier(fourier_ref[...], batch_ref[...], lane_bid_ref[...], b_slots)

    # scatter_sum over nodes -> one stacked matmul, accumulated across N-tiles (f32).
    sf_ref[0, :, :] = sf_ref[0, :, :] + lax.dot_general(
        rim.astype(compute_dtype), node_res.astype(compute_dtype),
        (((0,), (0,)), ((), ())), preferred_element_type=jnp.float32)


# ----------------------------- pass 2: message + update MLP -----------------------------
def _update_kernel(x_ref, fourier_ref, batch_ref, lane_bid_ref, filt2_ref,
                   w_res_ref, b_res_ref, out_ref, *, b_slots, compute_dtype):
    x = x_ref[...]                                   # [TN, D] f32
    rim = _masked_fourier(fourier_ref[...], batch_ref[...], lane_bid_ref[...], b_slots)

    # ewald_message @ w_upd folded into filt2 (no nonlinearity in between):
    # u = silu((rim @ filt) @ w_upd) == silu(rim @ (filt @ w_upd)).
    u = _silu(jnp.dot(rim.astype(compute_dtype), filt2_ref[...],
                      preferred_element_type=jnp.float32))

    # NUM_RES residual layers of the update MLP
    for r in range(NUM_RES):
        h = u
        for l in range(RES_LAYERS):
            idx = r * RES_LAYERS + l
            h = _silu(jnp.dot(h.astype(compute_dtype), w_res_ref[idx, :, :],
                              preferred_element_type=jnp.float32) + b_res_ref[idx, :, :])
        u = u + h

    out_ref[...] = (x + u).astype(out_ref.dtype)


# ----------------------------- wrapper -----------------------------
def ewald_block(node_scalar, k_dot_r, sinc_damping, batch, down_projection,
                params, num_batches, *, tile_n=512, compute_dtype=jnp.bfloat16,
                sf_partials=1):
    """sf_partials=2 splits pass 1 across the two TensorCores of a v7x chip."""
    n, d = node_scalar.shape
    k_pts = k_dot_r.shape[1]
    assert d == NODE_DIM and tile_n % 8 == 0
    two_k = 2 * k_pts

    # Lane-dense batch-slot padding so the rim/sf lane axis is a multiple of 128.
    step = 128 // math.gcd(two_k, 128)
    b_slots = pl.cdiv(num_batches, step) * step
    lanes = b_slots * two_k

    # Fourier terms precomputed once (no in-kernel cos/sin, single merged DMA stream).
    fourier = jnp.concatenate([jnp.cos(k_dot_r) * sinc_damping,
                               jnp.sin(k_dot_r) * sinc_damping],
                              axis=1).astype(jnp.float32)                 # [N, 2K]
    batch_col = batch.astype(jnp.int32)[:, None]                          # [N, 1]

    # Pad N up to a multiple of sf_partials*tile_n. Padded rows get graph id -1 so they
    # contribute nothing to the structure factors; their outputs are sliced off.
    # NOTE: real batch ids are assumed to lie in [0, num_batches).
    n_pad = pl.cdiv(n, tile_n * sf_partials) * tile_n * sf_partials
    pad = n_pad - n
    x = node_scalar
    if pad:
        x = jnp.pad(x, ((0, pad), (0, 0)))
        fourier = jnp.pad(fourier, ((0, pad), (0, 0)))
        batch_col = jnp.pad(batch_col, ((0, pad), (0, 0)), constant_values=-1)
    num_tiles = n_pad // tile_n
    tiles_per_partial = num_tiles // sf_partials

    # Per-lane batch-slot id (tiny constant-index input; avoids in-kernel integer division).
    lane_bid = jnp.repeat(jnp.arange(b_slots, dtype=jnp.int32), two_k)[None, :]  # [1, L]

    cd = compute_dtype
    w_pre = params["w_pre"].astype(cd)     # weights stored in compute dtype (bf16 path
    w_res = params["w_res"].astype(cd)     # halves weight VMEM/HBM footprint)

    vmem = 32 * 1024 * 1024

    # ---- pass 1: per-partial structure factors  sf_part: [sf_partials, L, D] f32 ----
    def p1_node(block):
        return pl.BlockSpec(block, lambda p, i: (p * tiles_per_partial + i, 0))

    def p1_const(shape):
        nd = len(shape)
        return pl.BlockSpec(shape, lambda p, i, _nd=nd: (0,) * _nd)

    sf_part = pl.pallas_call(
        functools.partial(_sf_kernel, b_slots=b_slots, compute_dtype=cd),
        out_shape=jax.ShapeDtypeStruct((sf_partials, lanes, d), jnp.float32),
        grid=(sf_partials, tiles_per_partial),
        in_specs=[p1_node((tile_n, d)),
                  p1_node((tile_n, two_k)),
                  p1_node((tile_n, 1)),
                  p1_const((1, lanes)),
                  p1_const(w_pre.shape),
                  p1_const(params["b_pre"].shape),
                  p1_const(params["ln_g"].shape),
                  p1_const(params["ln_b"].shape)],
        out_specs=pl.BlockSpec((1, lanes, d), lambda p, i: (p, 0, 0)),
        compiler_params=pltpu.CompilerParams(
            dimension_semantics=("parallel", "arbitrary"),
            vmem_limit_bytes=vmem),
    )(x, fourier, batch_col, lane_bid,
      w_pre, params["b_pre"], params["ln_g"], params["ln_b"])

    sf = sf_part[0] if sf_partials == 1 else jnp.sum(sf_part, axis=0)     # [L, D]

    # ---- node-independent filter, with update_layer's first Linear folded in (f32) ----
    kfilter = down_projection.astype(jnp.float32) @ params["w_up"].astype(jnp.float32)  # [K, D]
    kf = jnp.tile(jnp.concatenate([kfilter, kfilter], axis=0), (b_slots, 1))            # [L, D]
    filt2 = ((kf * sf) @ params["w_upd"].astype(jnp.float32)).astype(cd)                # [L, D]

    # ---- pass 2: ewald message + update MLP; node tiles are independent ----
    def p2_node(block):
        return pl.BlockSpec(block, lambda i: (i, 0))

    def p2_const(shape):
        nd = len(shape)
        return pl.BlockSpec(shape, lambda i, _nd=nd: (0,) * _nd)

    out = pl.pallas_call(
        functools.partial(_update_kernel, b_slots=b_slots, compute_dtype=cd),
        out_shape=jax.ShapeDtypeStruct((n_pad, d), node_scalar.dtype),
        grid=(num_tiles,),
        in_specs=[p2_node((tile_n, d)),
                  p2_node((tile_n, two_k)),
                  p2_node((tile_n, 1)),
                  p2_const((1, lanes)),
                  p2_const(filt2.shape),
                  p2_const(w_res.shape),
                  p2_const(params["b_res"].shape)],
        out_specs=p2_node((tile_n, d)),
        compiler_params=pltpu.CompilerParams(
            dimension_semantics=("parallel",),
            vmem_limit_bytes=vmem),
    )(x, fourier, batch_col, lane_bid, filt2, w_res, params["b_res"])

    return out[:n] if pad else out


# ----------------------------- params / reference -----------------------------
def init_params(key):
    ks = jax.random.split(key, 6)
    s = 1.0 / math.sqrt(NODE_DIM)
    return dict(
        w_pre=jax.random.normal(ks[0], (PRE_LAYERS, NODE_DIM, NODE_DIM), jnp.float32) * s,
        b_pre=jax.random.normal(ks[1], (PRE_LAYERS, 1, NODE_DIM), jnp.float32) * 0.1,
        ln_g=jnp.ones((1, NODE_DIM), jnp.float32),
        ln_b=jnp.zeros((1, NODE_DIM), jnp.float32),
        # nn.Linear(projection_dim, node_dim, bias=False) * 0.01; stored transposed [P, D]
        w_up=jax.random.normal(ks[2], (PROJ_DIM, NODE_DIM), jnp.float32)
             * (0.01 / math.sqrt(PROJ_DIM)),
        w_upd=jax.random.normal(ks[3], (NODE_DIM, NODE_DIM), jnp.float32) * s,
        w_res=jax.random.normal(ks[4], (NUM_RES * RES_LAYERS, NODE_DIM, NODE_DIM),
                                jnp.float32) * s,
        b_res=jax.random.normal(ks[5], (NUM_RES * RES_LAYERS, 1, NODE_DIM),
                                jnp.float32) * 0.1,
    )


def reference(x, kdr, sinc, batch, down, params, num_batches):
    """Pure-JAX f32 mirror of the PyTorch forward (correctness check)."""
    h = x
    for l in range(PRE_LAYERS):
        h = _silu(h @ params["w_pre"][l] + params["b_pre"][l])
    node_res = x + h
    mean = node_res.mean(-1, keepdims=True)
    var = ((node_res - mean) ** 2).mean(-1, keepdims=True)
    node_res = (node_res - mean) / jnp.sqrt(var + LN_EPS) * params["ln_g"] + params["ln_b"]

    real = (jnp.cos(kdr) * sinc)[:, :, None]                   # [N, K, 1]
    imag = (jnp.sin(kdr) * sinc)[:, :, None]
    sf_r = jax.ops.segment_sum(real * node_res[:, None, :], batch, num_segments=num_batches)
    sf_i = jax.ops.segment_sum(imag * node_res[:, None, :], batch, num_segments=num_batches)
    kfilter = (down @ params["w_up"])[None]                    # [1, K, D]
    fr = (kfilter * sf_r)[batch]                               # [N, K, D]
    fi = (kfilter * sf_i)[batch]
    msg = jnp.sum(fr * real + fi * imag, axis=1)               # [N, D]

    u = _silu(msg @ params["w_upd"])
    for r in range(NUM_RES):
        h = u
        for l in range(RES_LAYERS):
            idx = r * RES_LAYERS + l
            h = _silu(h @ params["w_res"][idx] + params["b_res"][idx])
        u = u + h
    return x + u


if __name__ == "__main__":
    key = jax.random.PRNGKey(0)
    kp, kx, kk, ksc, kd, kb = jax.random.split(key, 6)

    N, NK, B = 160, 16, 3          # nodes, k-points, graphs in batch
    TILE_N = 64                    # small tile to exercise a multi-step grid (prod: 512)
    params = init_params(kp)
    node_scalar = jax.random.normal(kx, (N, NODE_DIM), jnp.float32)
    k_dot_r = jax.random.normal(kk, (N, NK), jnp.float32) * 3.0
    sinc_damping = jax.random.uniform(ksc, (N, NK), jnp.float32, minval=0.5, maxval=1.0)
    batch = jax.random.randint(kb, (N,), 0, B, dtype=jnp.int32)
    down_projection = jax.random.normal(kd, (NK, PROJ_DIM), jnp.float32)

    ref = reference(node_scalar, k_dot_r, sinc_damping, batch, down_projection, params, B)

    # f32 compute path: check against the pure-JAX reference (tolerance covers the
    # different-but-valid f32 matmul precisions of XLA vs Mosaic).
    out_f32 = jax.block_until_ready(
        ewald_block(node_scalar, k_dot_r, sinc_damping, batch, down_projection,
                    params, B, tile_n=TILE_N, compute_dtype=jnp.float32))
    assert out_f32.shape == node_scalar.shape and out_f32.dtype == node_scalar.dtype
    err32 = float(jnp.max(jnp.abs(out_f32 - ref)))
    if not jnp.allclose(out_f32, ref, rtol=1e-2, atol=1e-2):
        raise SystemExit(f"f32 mismatch: max abs err {err32:e}")

    # Pass-1 split over 2 partials (the v7x two-TensorCore path) must give the same result.
    out_p2 = jax.block_until_ready(
        ewald_block(node_scalar, k_dot_r, sinc_damping, batch, down_projection,
                    params, B, tile_n=TILE_N, compute_dtype=jnp.float32, sf_partials=2))
    if not jnp.allclose(out_p2, ref, rtol=1e-2, atol=1e-2):
        raise SystemExit("sf_partials=2 mismatch")

    # bf16 MXU path (the fast path on v6e/v7x): mixed-precision tolerance.
    out_bf16 = jax.block_until_ready(
        ewald_block(node_scalar, k_dot_r, sinc_damping, batch, down_projection,
                    params, B, tile_n=TILE_N, compute_dtype=jnp.bfloat16))
    err16 = float(jnp.max(jnp.abs(out_bf16 - ref)))
    scale = float(jnp.max(jnp.abs(ref)))
    if not (bool(jnp.all(jnp.isfinite(out_bf16))) and err16 <= 0.05 * scale + 0.05):
        raise SystemExit(f"bf16 mismatch: max abs err {err16:e} (ref scale {scale:e})")

    print("KERNEL_OK")
</pallas_src>

<mosaic_0001>
module attributes {stable_mosaic.version = 11 : i64} {
  func.func @_sf_kernel(%arg0: i32, %arg1: i32, %arg2: memref<64x128xf32, #tpu.memory_space<vmem>>, %arg3: memref<64x32xf32, #tpu.memory_space<vmem>>, %arg4: memref<64x1xi32, #tpu.memory_space<vmem>>, %arg5: memref<1x128xi32, #tpu.memory_space<vmem>>, %arg6: memref<2x128x128xf32, #tpu.memory_space<vmem>>, %arg7: memref<2x1x128xf32, #tpu.memory_space<vmem>>, %arg8: memref<1x128xf32, #tpu.memory_space<vmem>>, %arg9: memref<1x128xf32, #tpu.memory_space<vmem>>, %arg10: memref<1x128x128xf32, #tpu.memory_space<vmem>>) attributes {dimension_semantics = [#tpu.dimension_semantics<parallel>, #tpu.dimension_semantics<arbitrary>], iteration_bounds = array<i64: 1, 3>, scalar_prefetch = 0 : i64, scratch_operands = 0 : i64, tpu.core_type = #tpu.core_type<tc>, window_params = [{transform_indices = @transform_0, window_bounds = array<i64: 64, 128>}, {transform_indices = @transform_1, window_bounds = array<i64: 64, 32>}, {transform_indices = @transform_2, window_bounds = array<i64: 64, 1>}, {pipeline_mode = #tpu.pipeline_mode<synchronous>, transform_indices = @transform_3, window_bounds = array<i64: 1, 128>}, {pipeline_mode = #tpu.pipeline_mode<synchronous>, transform_indices = @transform_4, window_bounds = array<i64: 2, 128, 128>}, {pipeline_mode = #tpu.pipeline_mode<synchronous>, transform_indices = @transform_5, window_bounds = array<i64: 2, 1, 128>}, {pipeline_mode = #tpu.pipeline_mode<synchronous>, transform_indices = @transform_6, window_bounds = array<i64: 1, 128>}, {pipeline_mode = #tpu.pipeline_mode<synchronous>, transform_indices = @transform_7, window_bounds = array<i64: 1, 128>}, {transform_indices = @transform_8, window_bounds = array<i64: 1, 128, 128>}]} {
    %c0_i32 = arith.constant 0 : i32
    %0 = arith.cmpi eq, %arg1, %c0_i32 : i32
    %1 = arith.extui %0 : i1 to i32
    %c0_i32_0 = arith.constant 0 : i32
    %2 = arith.cmpi ne, %1, %c0_i32_0 : i32
    scf.if %2 {
      %cst_43 = arith.constant 0.000000e+00 : f32
      %75 = vector.broadcast %cst_43 : f32 to vector<1x128x128xf32>
      %c0_44 = arith.constant 0 : index
      %c0_45 = arith.constant 0 : index
      %c0_46 = arith.constant 0 : index
      %76 = vector.load %arg10[%c0_44, %c0_45, %c0_46] : memref<1x128x128xf32, #tpu.memory_space<vmem>>, vector<1x128x128xf32>
      tpu.vector_store %arg10[%c0_44, %c0_45, %c0_46], %75 {strides = array<i32>} : memref<1x128x128xf32, #tpu.memory_space<vmem>>, vector<1x128x128xf32>,
    } else {
    }
    %c0 = arith.constant 0 : index
    %c0_1 = arith.constant 0 : index
    %3 = vector.load %arg2[%c0, %c0_1] : memref<64x128xf32, #tpu.memory_space<vmem>>, vector<64x128xf32>
    %c0_2 = arith.constant 0 : index
    %c0_3 = arith.constant 0 : index
    %c0_4 = arith.constant 0 : index
    %4 = vector.load %arg6[%c0_2, %c0_3, %c0_4] : memref<2x128x128xf32, #tpu.memory_space<vmem>>, vector<1x128x128xf32>
    %5 = vector.shape_cast %4 : vector<1x128x128xf32> to vector<128x128xf32>
    %cst = arith.constant dense<0.000000e+00> : vector<64x128xf32>
    %6 = tpu.matmul %3, %5, %cst {dimension_numbers = #tpu.dot_dimension_numbers<[1], [0], [0], [1], [0, 0, 1, 1], [], []>} : vector<64x128xf32>, vector<128x128xf32>, vector<64x128xf32> -> vector<64x128xf32>
    %c0_5 = arith.constant 0 : index
    %c0_6 = arith.constant 0 : index
    %c0_7 = arith.constant 0 : index
    %7 = vector.load %arg7[%c0_5, %c0_6, %c0_7] : memref<2x1x128xf32, #tpu.memory_space<vmem>>, vector<1x1x128xf32>
    %8 = vector.shape_cast %7 : vector<1x1x128xf32> to vector<1x128xf32>
    %9 = vector.broadcast %8 : vector<1x128xf32> to vector<64x128xf32>
    %10 = arith.addf %6, %9 : vector<64x128xf32>
    %cst_8 = arith.constant 5.000000e-01 : f32
    %11 = vector.broadcast %cst_8 : f32 to vector<64x128xf32>
    %12 = arith.mulf %11, %10 : vector<64x128xf32>
    %cst_9 = arith.constant 5.000000e-01 : f32
    %13 = vector.broadcast %cst_9 : f32 to vector<64x128xf32>
    %14 = arith.mulf %13, %10 : vector<64x128xf32>
    %15 = math.tanh %14 : vector<64x128xf32>
    %cst_10 = arith.constant 1.000000e+00 : f32
    %16 = vector.broadcast %cst_10 : f32 to vector<64x128xf32>
    %17 = arith.addf %15, %16 : vector<64x128xf32>
    %18 = arith.mulf %12, %17 : vector<64x128xf32>
    %c1 = arith.constant 1 : index
    %c0_11 = arith.constant 0 : index
    %c0_12 = arith.constant 0 : index
    %19 = vector.load %arg6[%c1, %c0_11, %c0_12] : memref<2x128x128xf32, #tpu.memory_space<vmem>>, vector<1x128x128xf32>
    %20 = vector.shape_cast %19 : vector<1x128x128xf32> to vector<128x128xf32>
    %cst_13 = arith.constant dense<0.000000e+00> : vector<64x128xf32>
    %21 = tpu.matmul %18, %20, %cst_13 {dimension_numbers = #tpu.dot_dimension_numbers<[1], [0], [0], [1], [0, 0, 1, 1], [], []>} : vector<64x128xf32>, vector<128x128xf32>, vector<64x128xf32> -> vector<64x128xf32>
    %c1_14 = arith.constant 1 : index
    %c0_15 = arith.constant 0 : index
    %c0_16 = arith.constant 0 : index
    %22 = vector.load %arg7[%c1_14, %c0_15, %c0_16] : memref<2x1x128xf32, #tpu.memory_space<vmem>>, vector<1x1x128xf32>
    %23 = vector.shape_cast %22 : vector<1x1x128xf32> to vector<1x128xf32>
    %24 = vector.broadcast %23 : vector<1x128xf32> to vector<64x128xf32>
    %25 = arith.addf %21, %24 : vector<64x128xf32>
    %cst_17 = arith.constant 5.000000e-01 : f32
    %26 = vector.broadcast %cst_17 : f32 to vector<64x128xf32>
    %27 = arith.mulf %26, %25 : vector<64x128xf32>
    %cst_18 = arith.constant 5.000000e-01 : f32
    %28 = vector.broadcast %cst_18 : f32 to vector<64x128xf32>
    %29 = arith.mulf %28, %25 : vector<64x128xf32>
    %30 = math.tanh %29 : vector<64x128xf32>
    %cst_19 = arith.constant 1.000000e+00 : f32
    %31 = vector.broadcast %cst_19 : f32 to vector<64x128xf32>
    %32 = arith.addf %30, %31 : vector<64x128xf32>
    %33 = arith.mulf %27, %32 : vector<64x128xf32>
    %34 = arith.addf %3, %33 : vector<64x128xf32>
    %cst_20 = arith.constant dense<0.000000e+00> : vector<64xf32>
    %35 = vector.multi_reduction <add>, %34, %cst_20 [1] : vector<64x128xf32> to vector<64xf32>
    %36 = vector.shape_cast %35 : vector<64xf32> to vector<64x1xf32>
    %cst_21 = arith.constant 1.280000e+02 : f32
    %37 = vector.broadcast %cst_21 : f32 to vector<64x1xf32>
    %38 = arith.divf %36, %37 : vector<64x1xf32>
    %39 = vector.broadcast %38 : vector<64x1xf32> to vector<64x128xf32>
    %40 = arith.subf %34, %39 : vector<64x128xf32>
    %41 = arith.mulf %40, %40 : vector<64x128xf32>
    %cst_22 = arith.constant dense<0.000000e+00> : vector<64xf32>
    %42 = vector.multi_reduction <add>, %41, %cst_22 [1] : vector<64x128xf32> to vector<64xf32>
    %43 = vector.shape_cast %42 : vector<64xf32> to vector<64x1xf32>
    %cst_23 = arith.constant 1.280000e+02 : f32
    %44 = vector.broadcast %cst_23 : f32 to vector<64x1xf32>
    %45 = arith.divf %43, %44 : vector<64x1xf32>
    %46 = vector.broadcast %38 : vector<64x1xf32> to vector<64x128xf32>
    %47 = arith.subf %34, %46 : vector<64x128xf32>
    %cst_24 = arith.constant 9.99999974E-6 : f32
    %48 = vector.broadcast %cst_24 : f32 to vector<64x1xf32>
    %49 = arith.addf %45, %48 : vector<64x1xf32>
    %50 = math.rsqrt %49 : vector<64x1xf32>
    %51 = vector.broadcast %50 : vector<64x1xf32> to vector<64x128xf32>
    %52 = arith.mulf %47, %51 : vector<64x128xf32>
    %c0_25 = arith.constant 0 : index
    %c0_26 = arith.constant 0 : index
    %53 = vector.load %arg8[%c0_25, %c0_26] : memref<1x128xf32, #tpu.memory_space<vmem>>, vector<1x128xf32>
    %54 = vector.broadcast %53 : vector<1x128xf32> to vector<64x128xf32>
    %55 = arith.mulf %52, %54 : vector<64x128xf32>
    %c0_27 = arith.constant 0 : index
    %c0_28 = arith.constant 0 : index
    %56 = vector.load %arg9[%c0_27, %c0_28] : memref<1x128xf32, #tpu.memory_space<vmem>>, vector<1x128xf32>
    %57 = vector.broadcast %56 : vector<1x128xf32> to vector<64x128xf32>
    %58 = arith.addf %55, %57 : vector<64x128xf32>
    %c0_29 = arith.constant 0 : index
    %c0_30 = arith.constant 0 : index
    %59 = vector.load %arg3[%c0_29, %c0_30] : memref<64x32xf32, #tpu.memory_space<vmem>>, vector<64x32xf32>
    %c0_31 = arith.constant 0 : index
    %c0_32 = arith.constant 0 : index
    %60 = vector.load %arg4[%c0_31, %c0_32] : memref<64x1xi32, #tpu.memory_space<vmem>>, vector<64x1xi32>
    %c0_33 = arith.constant 0 : index
    %c0_34 = arith.constant 0 : index
    %61 = vector.load %arg5[%c0_33, %c0_34] : memref<1x128xi32, #tpu.memory_space<vmem>>, vector<1x128xi32>
    %62 = tpu.concatenate %59, %59, %59, %59 in 1 : vector<64x32xf32>, vector<64x32xf32>, vector<64x32xf32>, vector<64x32xf32> -> vector<64x128xf32>
    %63 = vector.broadcast %61 : vector<1x128xi32> to vector<64x128xi32>
    %64 = vector.broadcast %60 : vector<64x1xi32> to vector<64x128xi32>
    %65 = arith.cmpi eq, %63, %64 : vector<64x128xi32>
    %cst_35 = arith.constant 0.000000e+00 : f32
    %66 = vector.broadcast %cst_35 : f32 to vector<64x128xf32>
    %67 = arith.select %65, %62, %66 : vector<64x128xi1>, vector<64x128xf32>
    %c0_36 = arith.constant 0 : index
    %c0_37 = arith.constant 0 : index
    %c0_38 = arith.constant 0 : index
    %68 = vector.load %arg10[%c0_36, %c0_37, %c0_38] : memref<1x128x128xf32, #tpu.memory_space<vmem>>, vector<1x128x128xf32>
    %69 = vector.shape_cast %68 : vector<1x128x128xf32> to vector<128x128xf32>
    %cst_39 = arith.constant dense<0.000000e+00> : vector<128x128xf32>
    %70 = tpu.matmul %67, %58, %cst_39 {dimension_numbers = #tpu.dot_dimension_numbers<[0], [0], [1], [1], [0, 1, 1, 1], [], []>} : vector<64x128xf32>, vector<64x128xf32>, vector<128x128xf32> -> vector<128x128xf32>
    %71 = arith.addf %69, %70 : vector<128x128xf32>
    %c0_40 = arith.constant 0 : index
    %c0_41 = arith.constant 0 : index
    %c0_42 = arith.constant 0 : index
    %72 = vector.load %arg10[%c0_40, %c0_41, %c0_42] : memref<1x128x128xf32, #tpu.memory_space<vmem>>, vector<1x128x128xf32>
    %73 = vector.shape_cast %72 : vector<1x128x128xf32> to vector<128x128xf32>
    %74 = vector.shape_cast %71 : vector<128x128xf32> to vector<1x128x128xf32>
    tpu.vector_store %arg10[%c0_40, %c0_41, %c0_42], %74 {strides = array<i32>} : memref<1x128x128xf32, #tpu.memory_space<vmem>>, vector<1x128x128xf32>,
    return
  }
  func.func @transform_0(%arg0: i32, %arg1: i32) -> (i32, i32) {
    %c3_i32 = arith.constant 3 : i32
    %0 = arith.muli %arg0, %c3_i32 : i32
    %1 = arith.addi %0, %arg1 : i32
    %c0_i32 = arith.constant 0 : i32
    %c0_i32_0 = arith.constant 0 : i32
    return %1, %c0_i32 : i32, i32
  }
  func.func @transform_1(%arg0: i32, %arg1: i32) -> (i32, i32) {
    %c3_i32 = arith.constant 3 : i32
    %0 = arith.muli %arg0, %c3_i32 : i32
    %1 = arith.addi %0, %arg1 : i32
    %c0_i32 = arith.constant 0 : i32
    %c0_i32_0 = arith.constant 0 : i32
    return %1, %c0_i32 : i32, i32
  }
  func.func @transform_2(%arg0: i32, %arg1: i32) -> (i32, i32) {
    %c3_i32 = arith.constant 3 : i32
    %0 = arith.muli %arg0, %c3_i32 : i32
    %1 = arith.addi %0, %arg1 : i32
    %c0_i32 = arith.constant 0 : i32
    %c0_i32_0 = arith.constant 0 : i32
    return %1, %c0_i32 : i32, i32
  }
  func.func @transform_3(%arg0: i32, %arg1: i32) -> (i32, i32) {
    %c0_i32 = arith.constant 0 : i32
    %c0_i32_0 = arith.constant 0 : i32
    %c0_i32_1 = arith.constant 0 : i32
    return %c0_i32, %c0_i32_0 : i32, i32
  }
  func.func @transform_4(%arg0: i32, %arg1: i32) -> (i32, i32, i32) {
    %c0_i32 = arith.constant 0 : i32
    %c0_i32_0 = arith.constant 0 : i32
    %c0_i32_1 = arith.constant 0 : i32
    %c0_i32_2 = arith.constant 0 : i32
    return %c0_i32, %c0_i32_0, %c0_i32_1 : i32, i32, i32
  }
  func.func @transform_5(%arg0: i32, %arg1: i32) -> (i32, i32, i32) {
    %c0_i32 = arith.constant 0 : i32
    %c0_i32_0 = arith.constant 0 : i32
    %c0_i32_1 = arith.constant 0 : i32
    %c0_i32_2 = arith.constant 0 : i32
    return %c0_i32, %c0_i32_0, %c0_i32_1 : i32, i32, i32
  }
  func.func @transform_6(%arg0: i32, %arg1: i32) -> (i32, i32) {
    %c0_i32 = arith.constant 0 : i32
    %c0_i32_0 = arith.constant 0 : i32
    %c0_i32_1 = arith.constant 0 : i32
    return %c0_i32, %c0_i32_0 : i32, i32
  }
  func.func @transform_7(%arg0: i32, %arg1: i32) -> (i32, i32) {
    %c0_i32 = arith.constant 0 : i32
    %c0_i32_0 = arith.constant 0 : i32
    %c0_i32_1 = arith.constant 0 : i32
    return %c0_i32, %c0_i32_0 : i32, i32
  }
  func.func @transform_8(%arg0: i32, %arg1: i32) -> (i32, i32, i32) {
    %c0_i32 = arith.constant 0 : i32
    %c0_i32_0 = arith.constant 0 : i32
    %c0_i32_1 = arith.constant 0 : i32
    return %arg0, %c0_i32, %c0_i32_0 : i32, i32, i32
  }
}

</mosaic_0001>

<bundles_post_ra>
// kernel: tpu_custom_call.1
= control target key start
LH: loop header
LB: loop body
LE: loop exit
PB: predicated region body
PF: predicated region fallthrough
CT: control target
= control target key end

     0   :  { %13 = vsyncpa [#allocation3], 0  ;;  %s2174_s0 = inlined_call_operand.vmem [shape: f32[192,128], index: 0, kind: input, shape index: {}]   ;;  %s2175_s1 = inlined_call_operand.vmem [shape: f32[192,32], index: 1, kind: input, shape index: {}]   ;;  %s2176_s2 = inlined_call_operand.vmem [shape: s32[192,1], index: 2, kind: input, shape index: {}]   ;;  %s2177_s3 = inlined_call_operand.vmem [shape: s32[1,128], index: 3, kind: input, shape index: {}]   ;;  %s2178_s4 = inlined_call_operand.vmem [shape: f32[2,128,128], index: 4, kind: input, shape index: {}]   ;;  %s2179_s5 = inlined_call_operand.vmem [shape: f32[2,1,128], index: 5, kind: input, shape index: {}]   ;;  %s2180_s6 = inlined_call_operand.vmem [shape: f32[1,128], index: 6, kind: input, shape index: {}]   ;;  %s2181_s7 = inlined_call_operand.hbm [shape: f32[1,128], index: 7, kind: input, shape index: {}]   ;;  %s2182_s8 = inlined_call_operand.hbm [shape: f32[1,128,128], index: 8, kind: output, shape index: {}]  }
   0x1   :  { %14 = vsyncpa [#allocation4], 0  ;;  %s1597_s27 = smov 0   ;;  %s1599_s28 = smov 0  }
   0x2   :  { %s1601_s29 = smov 0  }
   0x3 LB: > { %s1285_s30 = sadd.s32 4294967295, %s1540_s29   ;;  %s29_s9 = sadd.s32 1, %s1536_s28  ;;  %s1540_s29 = sphi %s1601_s29, %s20_s29   ;;  %s1536_s28 = sphi %s1599_s28, %s2196_s28   ;;  %s1532_s27 = sphi %s1597_s27, %s2195_s27  }
   0x4   : > { %p30_p0 = scmp.ge.s32.totalorder %s29_s9, 3  ;;  %p1286_p1 = scmp.ge.s32.totalorder %s1540_s29, 1 }
   0x5   : > { %p258_p2 = scmp.lt.s32.totalorder %s1540_s29, 4  ;;  %p1355_p4 = scmp.eq.s32.totalorder %s1285_s30, 0 }
   0x6   : > { %s2198_s9 = smov (%p30_p0, %s29_s9), 0  ;;  %s282_s12 = sshll.u32 %s2181_s7, 4  ;;  %s283_s12 = int_to_ptr.hbm [resolvable:$true] %s282_s12 }
   0x7   : > { %p259_p3 = pnand %p1286_p1, %p258_p2  ;;  %s1542_s13 = smov [#allocation2]  }
   0x8   : > { %s284_s14 = sshll.u32 %s1542_s13, 4  ;;  %s285_s14 = int_to_ptr.vmem [resolvable:$true] %s284_s14 }
   0x9   : > { %p1351_p5 = pneg %p259_p3  ;;  %336 = sbr.rel (%p259_p3) target bundleno = 1031 (0x407), region = 52 }
   0xb   : > { %p1352_p6 = pnand %p1355_p4, %p1351_p5 }
   0xd   : > { %1354 = dma.hbm_to_vmem [thread:$0]  (!%p1352_p6), %s283_s12, 16, %s285_s14, [#allocation3]  }
   0xe   : > { %1523 = dma.done.wait (%p1355_p4), [#allocation3], 16  }
   0xf   : > { %1525 = vsyncadd (%p1355_p4), [#allocation3], 4294967280  ;;  %s1291_s15 = sshll.u32 %s1532_s27, 3  ;;  %p1297_p8 = scmp.ne.s32.totalorder %s1532_s27, 0 }
  0x10   : > { %p385_p7 = scmp.lt.s32.totalorder %s1291_s15, 23 }
  0x11   : > { %415 = sbr.rel (%p1297_p8) target bundleno = 39 (0x27), region = 60 }
  0x12   : > { %s2200_s15 = smov (!%p385_p7, %s1291_s15), 23 }
  0x13   : > { %s1292_s16 = sshll.u32 %s2200_s15, 3 }
  0x14   : > { %s1627_s19 = scalar_lea.vmem %s2174_s0, %s1292_s16  ;;  %s1632_s22 = scalar_lea.vmem %s2175_s1, %s1292_s16 }
  0x15   : > { %s1637_s25 = scalar_lea.vmem %s2176_s2, %s1292_s16 }
  0x16   : > { %v1543_v0 = vmov 0.0  }
  0x17   : > { %416 = vst [vmem:[#allocation5] sm:$0xff] %v1543_v0 }
  0x18   : > { %417 = vst [vmem:[#allocation5 + $0x8] sm:$0xff] %v1543_v0 }
  0x19   : > { %418 = vst [vmem:[#allocation5 + $0x10] sm:$0xff] %v1543_v0 }
  0x1a   : > { %419 = vst [vmem:[#allocation5 + $0x18] sm:$0xff] %v1543_v0 }
  0x1b   : > { %420 = vst [vmem:[#allocation5 + $0x20] sm:$0xff] %v1543_v0 }
  0x1c   : > { %421 = vst [vmem:[#allocation5 + $0x28] sm:$0xff] %v1543_v0 }
  0x1d   : > { %422 = vst [vmem:[#allocation5 + $0x30] sm:$0xff] %v1543_v0 }
  0x1e   : > { %423 = vst [vmem:[#allocation5 + $0x38] sm:$0xff] %v1543_v0 }
  0x1f   : > { %424 = vst [vmem:[#allocation5 + $0x40] sm:$0xff] %v1543_v0 }
  0x20   : > { %425 = vst [vmem:[#allocation5 + $0x48] sm:$0xff] %v1543_v0 }
  0x21   : > { %426 = vst [vmem:[#allocation5 + $0x50] sm:$0xff] %v1543_v0 }
  0x22   : > { %427 = vst [vmem:[#allocation5 + $0x58] sm:$0xff] %v1543_v0 }
  0x23   : > { %428 = vst [vmem:[#allocation5 + $0x60] sm:$0xff] %v1543_v0 }
  0x24   : > { %429 = vst [vmem:[#allocation5 + $0x68] sm:$0xff] %v1543_v0 }
  0x25   : > { %430 = vst [vmem:[#allocation5 + $0x70] sm:$0xff] %v1543_v0 }
  0x26   : > { %431 = vst [vmem:[#allocation5 + $0x78] sm:$0xff] %v1543_v0 }
  0x27 PF: > { %v455_v1 = vld [vmem:[%s2178_s4 + $0x78] sm:$0xff]  ;;  %v454_v2 = vld [vmem:[%s2178_s4 + $0x70] sm:$0xff]  ;;  %v453_v3 = vld [vmem:[%s2178_s4 + $0x68] sm:$0xff]  ;;  %s1544_s13 = smov 96   ;;  %s1545_s14 = smov 64   ;;  %vm924_vm0 = vcmask 261120  }
  0x28   : > { %460 = vmatpush.msra.mxu0 %v455_v1  ;;  %v452_v4 = vld [vmem:[%s2178_s4 + $0x60] sm:$0xff]  ;;  %v451_v5 = vld [vmem:[%s2178_s4 + $0x58] sm:$0xff]  ;;  %v450_v6 = vld [vmem:[%s2178_s4 + $0x50] sm:$0xff]  ;;  %s1546_s15 = smov 32   ;;  %vm933_vm1 = vcmask 523264   ;;  %vm942_vm2 = vcmask 785408  }
  0x29   : > { %v449_v7 = vld [vmem:[%s2178_s4 + $0x48] sm:$0xff]  ;;  %v448_v8 = vld [vmem:[%s2178_s4 + $0x40] sm:$0xff]  ;;  %v447_v9 = vld [vmem:[%s2178_s4 + $0x38] sm:$0xff]  ;;  %s1549_s20 = smov [#allocation5]   ;;  %s1195_s26 = sshll.u32 %s2182_s8, 4  ;;  %s1196_s26 = int_to_ptr.hbm [resolvable:$true] %s1195_s26 }
  0x2a   : > { %461 = vmatpush.msra.mxu0 %v454_v2  ;;  %v446_v10 = vld [vmem:[%s2178_s4 + $0x30] sm:$0xff]  ;;  %v445_v11 = vld [vmem:[%s2178_s4 + $0x28] sm:$0xff]  ;;  %v444_v12 = vld [vmem:[%s2178_s4 + $0x20] sm:$0xff]  ;;  %v1547_v2 = vmov 0   ;;  %s1193_s21 = sshll.u32 %s1549_s20, 4  ;;  %p1357_p9 = scmp.eq.s32.totalorder %s1285_s30, 2  ;;  %s1194_s21 = int_to_ptr.vmem [resolvable:$true] %s1193_s21 }
  0x2b   : > { %v443_v13 = vld [vmem:[%s2178_s4 + $0x18] sm:$0xff]  ;;  %v442_v14 = vld [vmem:[%s2178_s4 + $0x10] sm:$0xff]  ;;  %v441_v15 = vld [vmem:[%s2178_s4 + $0x8] sm:$0xff]  ;;  %1395 = vset.pattern.permute.xlu0 %v1547_v2  ;;  %1394 = vset.pattern.permute.xlu2 %v1547_v2  ;;  %s1550_s27 = smov 128   ;;  %s1551_s10 = smov 8  }
  0x2c   : > { %462 = vmatpush.msra.mxu0 %v453_v3  ;;  %v440_v16 = vld [vmem:[%s2178_s4] sm:$0xff]  ;;  %v1693_v18 = vld [vmem:[%s1627_s19 + $0x8] sm:$0xff]  ;;  %v1697_v19 = vld [vmem:[%s1627_s19 + $0x10] sm:$0xff]  ;;  %1396 = vset.pattern.permute.xlu1 %v1547_v2 }
  0x2d   : > { %v1689_v17 = vld [vmem:[%s1627_s19] sm:$0xff]  ;;  %v1701_v20 = vld [vmem:[%s1627_s19 + $0x18] sm:$0xff]  ;;  %v1312_v22 = vld [vmem:[%s2178_s4 + $0xf0] sm:$0xff] }
  0x2e   : > { %463 = vmatpush.msra.mxu0 %v452_v4  ;;  %v1313_v21 = vld [vmem:[%s2178_s4 + $0xf8] sm:$0xff]  ;;  %v1311_v23 = vld [vmem:[%s2178_s4 + $0xe8] sm:$0xff]  ;;  %v1310_v24 = vld [vmem:[%s2178_s4 + $0xe0] sm:$0xff] }
  0x2f   : > { %555 = vmatpush.msra.mxu1 %v1313_v21  ;;  %v1717_v25 = vld [vmem:[%s1627_s19 + $0x20] sm:$0xff]  ;;  %v1309_v26 = vld [vmem:[%s2178_s4 + $0xd8] sm:$0xff]  ;;  %v1308_v27 = vld [vmem:[%s2178_s4 + $0xd0] sm:$0xff] }
  0x30   : > { %464 = vmatpush.msra.mxu0 %v451_v5  ;;  %v1307_v28 = vld [vmem:[%s2178_s4 + $0xc8] sm:$0xff]  ;;  %v1306_v29 = vld [vmem:[%s2178_s4 + $0xc0] sm:$0xff]  ;;  %v1737_v31 = vld [vmem:[%s1627_s19 + $0x30] sm:$0xff] }
  0x31   : > { %556 = vmatpush.msra.mxu1 %v1312_v22  ;;  %v1733_v30 = vld [vmem:[%s1627_s19 + $0x28] sm:$0xff]  ;;  %v1741_v32 = vld [vmem:[%s1627_s19 + $0x38] sm:$0xff]  ;;  %v1304_v34 = vld [vmem:[%s2178_s4 + $0xb0] sm:$0xff] }
  0x32   : > { %465 = vmatpush.msra.mxu0 %v450_v6  ;;  %v1305_v33 = vld [vmem:[%s2178_s4 + $0xb8] sm:$0xff]  ;;  %v1303_v35 = vld [vmem:[%s2178_s4 + $0xa8] sm:$0xff]  ;;  %v1302_v36 = vld [vmem:[%s2178_s4 + $0xa0] sm:$0xff] }
  0x33   : > { %557 = vmatpush.msra.mxu1 %v1311_v23  ;;  %v1301_v37 = vld [vmem:[%s2178_s4 + $0x98] sm:$0xff]  ;;  %v1300_v38 = vld [vmem:[%s2178_s4 + $0x90] sm:$0xff]  ;;  %v1299_v39 = vld [vmem:[%s2178_s4 + $0x88] sm:$0xff] }
  0x34   : > { %466 = vmatpush.msra.mxu0 %v449_v7  ;;  %v1298_v40 = vld [vmem:[%s2178_s4 + $0x80] sm:$0xff]  ;;  %v1785_v51 = vld [vmem:[%s1632_s22 + $0x8] sm:$0xff]  ;;  %v1793_v58 = vld [vmem:[%s1632_s22 + $0x10] sm:$0xff] }
  0x35   : > { %558 = vmatpush.msra.mxu1 %v1310_v24  ;;  %v1771_v41 = vld [vmem:[%s2179_s5] ss:$0 sm:$0xff]  ;;  %v836_v4 = vld [vmem:[%s1637_s25 + $0x8] sm:$0xff]  ;;  %v1803_v6 = vld [vmem:[%s1632_s22 + $0x18] sm:$0xff] }
  0x36   : > { %467 = vmatpush.msra.mxu0 %v448_v8  ;;  %v1775_v45 = vld [vmem:[%s1632_s22] sm:$0xff] }
  0x37   : > { %559 = vmatpush.msra.mxu1 %v1309_v26  ;;  %900 = vrot.lane.b32.xlu1 %v1775_v45, %s1544_s13  ;;  %v1813_v23 = vld [vmem:[%s1632_s22 + $0x20] sm:$0xff] }
  0x38   : > { %468 = vmatpush.msra.mxu0 %v447_v9  ;;  %876 = vrot.lane.b32.xlu0 %v1775_v45, %s1545_s14 }
  0x39   : > { %560 = vmatpush.msra.mxu1 %v1308_v27  ;;  %852 = vrot.lane.b32.xlu2 %v1775_v45, %s1546_s15 }
  0x3a   : > { %469 = vmatpush.msra.mxu0 %v446_v10 }
  0x3b   : > { %561 = vmatpush.msra.mxu1 %v1307_v28 }
  0x3c   : > { %470 = vmatpush.msra.mxu0 %v445_v11 }
  0x3d   : > { %562 = vmatpush.msra.mxu1 %v1306_v29 }
  0x3e   : > { %471 = vmatpush.msra.mxu0 %v444_v12  ;;  %v837_v12 = vld [vmem:[%s1637_s25 + $0x10] sm:$0xff] }
  0x3f   : > { %563 = vmatpush.msra.mxu1 %v1305_v33  ;;  %902 = vrot.lane.b32.xlu1 %v1785_v51, %s1544_s13 }
  0x40   : > { %472 = vmatpush.msra.mxu0 %v443_v13  ;;  %854 = vrot.lane.b32.xlu0 %v1785_v51, %s1546_s15  ;;  %v835_v13 = vld [vmem:[%s1637_s25] sm:$0xff] }
  0x41   : > { %564 = vmatpush.msra.mxu1 %v1304_v34  ;;  %953 = vperm.xlu2 %1394, %v835_v13  }
  0x42   : > { %473 = vmatpush.msra.mxu0 %v442_v14 }
  0x43   : > { %565 = vmatpush.msra.mxu1 %v1303_v35 }
  0x44   : > { %474 = vmatpush.msra.mxu0 %v441_v15 }
  0x45   : > { %566 = vmatpush.msra.mxu1 %v1302_v36  ;;  %v838_v36 = vld [vmem:[%s1637_s25 + $0x18] sm:$0xff] }
  0x46   : > { %475 = vmatpush.msra.mxu0 %v440_v16 }
  0x47   : > { %476 = vmatmul.f32.vlgmr.msra.gmra.mxu0 %v1689_v17  ;;  %567 = vmatpush.msra.mxu1 %v1301_v37 }
  0x48   : > { %880 = vrot.lane.b32.xlu1 %v1793_v58, %s1545_s14  ;;  %956 = vperm.xlu0 %1395, %v836_v4  }
  0x49   : > { %568 = vmatpush.msra.mxu1 %v1300_v38  ;;  %878 = vrot.lane.b32.xlu2 %v1785_v51, %s1545_s14 }
  0x4b   : > { %569 = vmatpush.msra.mxu1 %v1299_v39 }
  0x4d   : > { %570 = vmatpush.msra.mxu1 %v1298_v40 }
  0x4f   : > { %479 = vmatmul.f32.gmra.mxu0 %v1693_v18 }
  0x50   : > { %904 = vrot.lane.b32.xlu1 %v1793_v58, %s1544_s13  ;;  %959 = vperm.xlu0 %1395, %v837_v12  }
  0x51   : > { %856 = vrot.lane.b32.xlu2 %v1793_v58, %s1546_s15 }
  0x57   : > { %482 = vmatmul.f32.gmra.mxu0 %v1697_v19 }
  0x58   : > { %858 = vrot.lane.b32.xlu1 %v1803_v6, %s1546_s15  ;;  %884 = vrot.lane.b32.xlu0 %v1813_v23, %s1545_s14 }
  0x59   : > { %860 = vrot.lane.b32.xlu2 %v1813_v23, %s1546_s15 }
  0x5f   : > { %485 = vmatmul.f32.gmra.mxu0 %v1701_v20 }
  0x60   : > { %882 = vrot.lane.b32.xlu1 %v1803_v6, %s1545_s14  ;;  %908 = vrot.lane.b32.xlu0 %v1813_v23, %s1544_s13 }
  0x67   : > { %488 = vmatmul.f32.gmra.mxu0 %v1717_v25 }
  0x68   : > { %906 = vrot.lane.b32.xlu1 %v1803_v6, %s1544_s13 }
  0x6f   : > { %491 = vmatmul.f32.gmra.mxu0 %v1733_v30 }
  0x70   : > { %962 = vperm.xlu1 %1396, %v838_v36  }
  0x77   : > { %494 = vmatmul.f32.gmra.mxu0 %v1737_v31 }
  0x7f   : > { %497 = vmatmul.f32.gmra.mxu0 %v1741_v32 }
  0xc4   : > { %v477_v42 = vpop.f32.mrf.mxu0 }
  0xc5   : > { %v478_v43 = vadd.f32 %v1771_v41, %v477_v42  ;;  %v839_v42 = vld [vmem:[%s1637_s25 + $0x20] sm:$0xff] }
  0xc6   : > { %965 = vperm.xlu0 %1395, %v839_v42  }
  0xc7   : > { %v501_v44 = vmul.f32 0.5, %v478_v43 }
  0xc9   : > { %1402 = vtanh.f32 %v501_v44 }
  0xcc   : > { %v480_v46 = vpop.f32.mrf.mxu0 }
  0xcd   : > { %v481_v47 = vadd.f32 %v1771_v41, %v480_v46 }
  0xcf   : > { %v1403_v48 = vpop.eup %1402  ;;  %v502_v49 = vmul.f32 0.5, %v481_v47  ;;  %v1837_v47 = vld [vmem:[%s1632_s22 + $0x30] sm:$0xff] }
  0xd0   : > { %v517_v50 = vadd.f32 1.0, %v1403_v48  ;;  %888 = vrot.lane.b32.xlu0 %v1837_v47, %s1545_s14  ;;  %v840_v48 = vld [vmem:[%s1637_s25 + $0x28] sm:$0xff] }
  0xd1   : > { %1404 = vtanh.f32 %v502_v49 }
  0xd2   : > { %v525_v52 = vmul.f32 %v517_v50, %v501_v44 }
  0xd4   : > { %v483_v53 = vpop.f32.mrf.mxu0  ;;  %571 = vmatmul.f32.vlgmr.msra.gmra.mxu1 %v525_v52  ;;  %v877_v52 = vpop.permute.xlu0 %876 }
  0xd5   : > { %v484_v54 = vadd.f32 %v1771_v41, %v483_v53  ;;  %v853_v53 = vpop.permute.xlu2 %852 }
  0xd7   : > { %v1405_v55 = vpop.eup %1404  ;;  %v503_v56 = vmul.f32 0.5, %v484_v54 }
  0xd8   : > { %v518_v57 = vadd.f32 1.0, %v1405_v55  ;;  %912 = vrot.lane.b32.xlu0 %v1837_v47, %s1544_s13  ;;  %v1853_v55 = vld [vmem:[%s2179_s5 + $0x1] ss:$0 sm:$0xff] }
  0xd9   : > { %1406 = vtanh.f32 %v503_v56 }
  0xda   : > { %v526_v59 = vmul.f32 %v518_v57, %v502_v49  ;;  %v901_v49 = vpop.permute.xlu1 %900 }
  0xdc   : > { %v486_v60 = vpop.f32.mrf.mxu0  ;;  %574 = vmatmul.f32.gmra.mxu1 %v526_v59 }
  0xdd   : > { %v487_v61 = vadd.f32 %v1771_v41, %v486_v60  ;;  %v925_v60 = vsel %vm924_vm0, %v1775_v45, %v853_v53 }
  0xdf   : > { %v1407_v62 = vpop.eup %1406  ;;  %v504_v63 = vmul.f32 0.5, %v487_v61  ;;  %v1861_v61 = vld [vmem:[%s2177_s3] ss:$0 sm:$0xff] }
  0xe0   : > { %v519_v0 = vadd.f32 1.0, %v1407_v62  ;;  %v954_v62 = vpop.permute.xlu2 %953 }
  0xe1   : > { %1408 = vtanh.f32 %v504_v63  ;;  %vm976_vm3 = vcmp.eq.s32.totalorder %v1861_v61, %v954_v62 }
  0xe2   : > { %v527_v1 = vmul.f32 %v519_v0, %v503_v56  ;;  %v903_v50 = vpop.permute.xlu1 %902  ;;  %v855_v56 = vpop.permute.xlu0 %854 }
  0xe3   : > { %v926_v45 = vsel %vm924_vm0, %v1785_v51, %v855_v56 }
  0xe4   : > { %v489_v3 = vpop.f32.mrf.mxu0  ;;  %577 = vmatmul.f32.gmra.mxu1 %v527_v1 }
  0xe5   : > { %v490_v5 = vadd.f32 %v1771_v41, %v489_v3 }
  0xe7   : > { %v1409_v7 = vpop.eup %1408  ;;  %v505_v8 = vmul.f32 0.5, %v490_v5 }
  0xe8   : > { %v520_v9 = vadd.f32 1.0, %v1409_v7 }
  0xe9   : > { %1410 = vtanh.f32 %v505_v8 }
  0xea   : > { %v528_v10 = vmul.f32 %v520_v9, %v504_v63  ;;  %v881_v54 = vpop.permute.xlu1 %880  ;;  %v934_v63 = vsel %vm933_vm1, %v925_v60, %v877_v52  ;;  %v957_v4 = vpop.permute.xlu0 %956 }
  0xeb   : > { %v943_v2 = vsel %vm942_vm2, %v934_v63, %v901_v49  ;;  %vm977_vm4 = vcmp.eq.s32.totalorder %v1861_v61, %v957_v4 }
  0xec   : > { %v492_v11 = vpop.f32.mrf.mxu0  ;;  %580 = vmatmul.f32.gmra.mxu1 %v528_v10  ;;  %v1866_v3 = vsel %vm976_vm3, %v943_v2, 0.0 }
  0xed   : > { %v493_v14 = vadd.f32 %v1771_v41, %v492_v11 }
  0xef   : > { %v1411_v15 = vpop.eup %1410  ;;  %v506_v16 = vmul.f32 0.5, %v493_v14 }
  0xf0   : > { %v521_v21 = vadd.f32 1.0, %v1411_v15 }
  0xf1   : > { %1412 = vtanh.f32 %v506_v16 }
  0xf2   : > { %v529_v22 = vmul.f32 %v521_v21, %v505_v8  ;;  %v905_v0 = vpop.permute.xlu1 %904  ;;  %v879_v8 = vpop.permute.xlu2 %878 }
  0xf3   : > { %v935_v9 = vsel %vm933_vm1, %v926_v45, %v879_v8  ;;  %v960_v21 = vpop.permute.xlu0 %959 }
  0xf4   : > { %v495_v24 = vpop.f32.mrf.mxu0  ;;  %583 = vmatmul.f32.gmra.mxu1 %v529_v22  ;;  %v944_v13 = vsel %vm942_vm2, %v935_v9, %v903_v50  ;;  %vm978_vm5 = vcmp.eq.s32.totalorder %v1861_v61, %v960_v21 }
  0xf5   : > { %v496_v26 = vadd.f32 %v1771_v41, %v495_v24  ;;  %v1874_v15 = vsel %vm977_vm4, %v944_v13, 0.0 }
  0xf7   : > { %v1413_v27 = vpop.eup %1412  ;;  %v507_v28 = vmul.f32 0.5, %v496_v26 }
  0xf8   : > { %v522_v29 = vadd.f32 1.0, %v1413_v27 }
  0xf9   : > { %1414 = vtanh.f32 %v507_v28 }
  0xfa   : > { %v530_v33 = vmul.f32 %v522_v29, %v506_v16  ;;  %v859_v10 = vpop.permute.xlu1 %858  ;;  %v857_v26 = vpop.permute.xlu2 %856 }
  0xfb   : > { %v927_v27 = vsel %vm924_vm0, %v1793_v58, %v857_v26 }
  0xfc   : > { %v498_v34 = vpop.f32.mrf.mxu0  ;;  %586 = vmatmul.f32.gmra.mxu1 %v530_v33 }
  0xfd   : > { %v499_v35 = vadd.f32 %v1771_v41, %v498_v34  ;;  %v1832_v41 = vld [vmem:[%s1632_s22 + $0x28] sm:$0xff]  ;;  %v936_v34 = vsel %vm933_vm1, %v927_v27, %v881_v54 }
  0xfe   : > { %862 = vrot.lane.b32.xlu1 %v1832_v41, %s1546_s15  ;;  %886 = vrot.lane.b32.xlu2 %v1832_v41, %s1545_s14  ;;  %v945_v36 = vsel %vm942_vm2, %v936_v34, %v905_v0 }
  0xff   : > { %v1415_v37 = vpop.eup %1414  ;;  %v508_v38 = vmul.f32 0.5, %v499_v35 }
 0x100   : > { %v523_v39 = vadd.f32 1.0, %v1415_v37 }
 0x101   : > { %1416 = vtanh.f32 %v508_v38 }
 0x102   : > { %v531_v40 = vmul.f32 %v523_v39, %v507_v28  ;;  %v883_v28 = vpop.permute.xlu1 %882  ;;  %v861_v62 = vpop.permute.xlu2 %860 }
 0x103   : > { %v929_v63 = vsel %vm924_vm0, %v1813_v23, %v861_v62 }
 0x104   : > { %589 = vmatmul.f32.gmra.mxu1 %v531_v40 }
 0x106   : > { %910 = vrot.lane.b32.xlu1 %v1832_v41, %s1544_s13  ;;  %864 = vrot.lane.b32.xlu2 %v1837_v47, %s1546_s15 }
 0x107   : > { %v1417_v43 = vpop.eup %1416 }
 0x108   : > { %v524_v44 = vadd.f32 1.0, %v1417_v43 }
 0x10a   : > { %v532_v46 = vmul.f32 %v524_v44, %v508_v38  ;;  %v885_v38 = vpop.permute.xlu0 %884  ;;  %v907_v42 = vpop.permute.xlu1 %906 }
 0x10c   : > { %592 = vmatmul.f32.gmra.mxu1 %v532_v46  ;;  %v928_v46 = vsel %vm924_vm0, %v1803_v6, %v859_v10 }
 0x10d   : > { %v937_v50 = vsel %vm933_vm1, %v928_v46, %v883_v28  ;;  %v1548_v46 = vmov 128.0  }
 0x10e   : > { %968 = vperm.xlu1 %1396, %v840_v48   ;;  %v946_v6 = vsel %vm942_vm2, %v937_v50, %v907_v42 }
 0x112   : > { %v909_v52 = vpop.permute.xlu0 %908  ;;  %v963_v56 = vpop.permute.xlu1 %962 }
 0x113   : > { %vm979_vm6 = vcmp.eq.s32.totalorder %v1861_v61, %v963_v56 }
 0x138   : > { %v966_v2 = vpop.permute.xlu0 %965 }
 0x139   : > { %vm980_vm7 = vcmp.eq.s32.totalorder %v1861_v61, %v966_v2 }
 0x151   : > { %v572_v57 = vpop.f32.mrf.mxu1 }
 0x152   : > { %v573_v59 = vadd.f32 %v1853_v55, %v572_v57 }
 0x154   : > { %v596_v1 = vmul.f32 0.5, %v573_v59 }
 0x156   : > { %1418 = vtanh.f32 %v596_v1 }
 0x158   : > { %v887_v13 = vpop.permute.xlu2 %886 }
 0x159   : > { %v575_v5 = vpop.f32.mrf.mxu1 }
 0x15a   : > { %v576_v7 = vadd.f32 %v1853_v55, %v575_v5 }
 0x15c   : > { %v1419_v11 = vpop.eup %1418  ;;  %v597_v12 = vmul.f32 0.5, %v576_v7 }
 0x15d   : > { %v612_v14 = vadd.f32 1.0, %v1419_v11 }
 0x15e   : > { %1420 = vtanh.f32 %v597_v12 }
 0x15f   : > { %v620_v16 = vmul.f32 %v612_v14, %v596_v1  ;;  %v938_v1 = vsel %vm933_vm1, %v929_v63, %v885_v38 }
 0x160   : > { %v947_v4 = vsel %vm942_vm2, %v938_v1, %v909_v52 }
 0x161   : > { %v578_v51 = vpop.f32.mrf.mxu1  ;;  %v1877_v22 = vadd.f32 %v620_v16, %v1689_v17  ;;  %v1886_v17 = vsel %vm978_vm5, %v945_v36, 0.0  ;;  %v1913_v7 = vsel %vm980_vm7, %v947_v4, 0.0 }
 0x162   : > { %v579_v24 = vadd.f32 %v1853_v55, %v578_v51 }
 0x163   : > { %636 = vadd.xlane.f32.xlu1 %v1877_v22 }
 0x164   : > { %v1421_v29 = vpop.eup %1420  ;;  %v598_v33 = vmul.f32 0.5, %v579_v24 }
 0x165   : > { %v613_v35 = vadd.f32 1.0, %v1421_v29 }
 0x166   : > { %1422 = vtanh.f32 %v598_v33 }
 0x167   : > { %v621_v37 = vmul.f32 %v613_v35, %v597_v12 }
 0x169   : > { %v581_v39 = vpop.f32.mrf.mxu1  ;;  %v1889_v40 = vadd.f32 %v621_v37, %v1693_v18 }
 0x16a   : > { %v582_v58 = vadd.f32 %v1853_v55, %v581_v39 }
 0x16b   : > { %638 = vadd.xlane.f32.xlu0 %v1889_v40 }
 0x16c   : > { %v1423_v43 = vpop.eup %1422  ;;  %v599_v44 = vmul.f32 0.5, %v582_v58 }
 0x16d   : > { %v614_v48 = vadd.f32 1.0, %v1423_v43 }
 0x16e   : > { %1424 = vtanh.f32 %v599_v44 }
 0x16f   : > { %v622_v49 = vmul.f32 %v614_v48, %v598_v33  ;;  %v1929_v48 = vpop.permute.xlu0 %888 }
 0x170   : > { %v863_v23 = vpop.permute.xlu1 %862 }
 0x171   : > { %v584_v53 = vpop.f32.mrf.mxu1  ;;  %v1897_v18 = vadd.f32 %v622_v49, %v1697_v19  ;;  %v1905_v19 = vsel %vm979_vm6, %v946_v6, 0.0  ;;  %v930_v11 = vsel %vm924_vm0, %v1832_v41, %v863_v23 }
 0x172   : > { %v585_v54 = vadd.f32 %v1853_v55, %v584_v53  ;;  %v939_v14 = vsel %vm933_vm1, %v930_v11, %v887_v13 }
 0x173   : > { %640 = vadd.xlane.f32.xlu2 %v1897_v18 }
 0x174   : > { %v1425_v57 = vpop.eup %1424  ;;  %v600_v59 = vmul.f32 0.5, %v585_v54 }
 0x175   : > { %v615_v60 = vadd.f32 1.0, %v1425_v57 }
 0x176   : > { %1426 = vtanh.f32 %v600_v59 }
 0x177   : > { %v623_v0 = vmul.f32 %v615_v60, %v599_v44  ;;  %v1931_v50 = vpop.permute.xlu0 %912 }
 0x178   : > { %v911_v24 = vpop.permute.xlu1 %910 }
 0x179   : > { %v587_v45 = vpop.f32.mrf.mxu1  ;;  %v1911_v5 = vadd.f32 %v623_v0, %v1701_v20  ;;  %v1923_v28 = vsel %vm942_vm2, %v939_v14, %v911_v24  ;;  %v842_v24 = vld [vmem:[%s1637_s25 + $0x38] sm:$0xff] }
 0x17a   : > { %v588_v8 = vadd.f32 %v1853_v55, %v587_v45 }
 0x17b   : > { %642 = vadd.xlane.f32.xlu2 %v1911_v5 }
 0x17c   : > { %v1427_v9 = vpop.eup %1426  ;;  %v601_v10 = vmul.f32 0.5, %v588_v8 }
 0x17d   : > { %v616_v12 = vadd.f32 1.0, %v1427_v9 }
 0x17e   : > { %1428 = vtanh.f32 %v601_v10 }
 0x17f   : > { %v624_v16 = vmul.f32 %v616_v12, %v600_v59 }
 0x180   : > { %v969_v60 = vpop.permute.xlu1 %968 }
 0x181   : > { %v590_v20 = vpop.f32.mrf.mxu1  ;;  %v632_v21 = vadd.f32 %v624_v16, %v1717_v25  ;;  %vm981_vm9 = vcmp.eq.s32.totalorder %v1861_v61, %v969_v60 }
 0x182   : > { %v591_v51 = vadd.f32 %v1853_v55, %v590_v20 }
 0x183   : > { %644 = vadd.xlane.f32.xlu1 %v632_v21 }
 0x184   : > { %v1429_v26 = vpop.eup %1428  ;;  %v602_v27 = vmul.f32 0.5, %v591_v51  ;;  %v841_v51 = vld [vmem:[%s1637_s25 + $0x30] sm:$0xff] }
 0x185   : > { %v617_v29 = vadd.f32 1.0, %v1429_v26 }
 0x186   : > { %1430 = vtanh.f32 %v602_v27 }
 0x187   : > { %v625_v41 = vmul.f32 %v617_v29, %v601_v10 }
 0x189   : > { %v593_v33 = vpop.f32.mrf.mxu1  ;;  %v633_v34 = vadd.f32 %v625_v41, %v1733_v30 }
 0x18a   : > { %v594_v35 = vadd.f32 %v1853_v55, %v593_v33 }
 0x18b   : > { %646 = vadd.xlane.f32.xlu1 %v633_v34 }
 0x18c   : > { %v1431_v36 = vpop.eup %1430  ;;  %v603_v25 = vmul.f32 0.5, %v594_v35 }
 0x18d   : > { %v618_v37 = vadd.f32 1.0, %v1431_v36 }
 0x18e   : > { %1432 = vtanh.f32 %v603_v25 }
 0x18f   : > { %v626_v38 = vmul.f32 %v618_v37, %v602_v27  ;;  %1434 = vrcp.f32 %v1548_v46 }
 0x191   : > { %v634_v39 = vadd.f32 %v626_v38, %v1737_v31  ;;  %v1933_v31 = vpop.permute.xlu2 %864 }
 0x193   : > { %648 = vadd.xlane.f32.xlu0 %v634_v39 }
 0x194   : > { %v1433_v58 = vpop.eup %1432 }
 0x195   : > { %v619_v42 = vadd.f32 1.0, %v1433_v58  ;;  %v1435_v30 = vpop.eup %1434 }
 0x196   : > { %v653_v55 = vmul.f32 128.0, %v1435_v30  ;;  %vm657_vm8 = vweird.f32 %v1435_v30 }
 0x197   : > { %v627_v43 = vmul.f32 %v619_v42, %v603_v25 }
 0x198   : > { %v654_v49 = vsub.f32 1.0, %v653_v55 }
 0x199   : > { %v635_v44 = vadd.f32 %v627_v43, %v1741_v32 }
 0x19a   : > { %v655_v52 = vmul.f32 %v1435_v30, %v654_v49 }
 0x19b   : > { %650 = vadd.xlane.f32.xlu0 %v635_v44 }
 0x19c   : > { %v656_v53 = vadd.f32 %v1435_v30, %v655_v52 }
 0x19e   : > { %v1935_v54 = vsel %vm657_vm8, %v1435_v30, %v656_v53 }
 0x1d6   : > { %v637_v1 = vpop.xlane.xlu1 %636 }
 0x1d7   : > { %v659_v33 = vmul.f32 %v1935_v54, %v637_v1 }
 0x1de   : > { %v639_v56 = vpop.xlane.xlu0 %638 }
 0x1df   : > { %v660_v32 = vmul.f32 %v1935_v54, %v639_v56 }
 0x1e1   : > { %v1939_v57 = vsub.f32 %v1889_v40, %v660_v32 }
 0x1e3   : > { %v676_v59 = vmul.f32 %v1939_v57, %v1939_v57 }
 0x1e5   : > { %685 = vadd.xlane.f32.xlu2 %v676_v59 }
 0x1e6   : > { %v641_v62 = vpop.xlane.xlu2 %640 }
 0x1e7   : > { %v661_v6 = vmul.f32 %v1935_v54, %v641_v62 }
 0x1e9   : > { %v1945_v63 = vsub.f32 %v1897_v18, %v661_v6 }
 0x1eb   : > { %v677_v0 = vmul.f32 %v1945_v63, %v1945_v63 }
 0x1ed   : > { %687 = vadd.xlane.f32.xlu1 %v677_v0 }
 0x1ee   : > { %v643_v2 = vpop.xlane.xlu2 %642 }
 0x1ef   : > { %v662_v40 = vmul.f32 %v1935_v54, %v643_v2 }
 0x1f1   : > { %v1951_v4 = vsub.f32 %v1911_v5, %v662_v40 }
 0x1f3   : > { %v678_v45 = vmul.f32 %v1951_v4, %v1951_v4 }
 0x1f5   : > { %689 = vadd.xlane.f32.xlu0 %v678_v45 }
 0x1f6   : > { %v645_v8 = vpop.xlane.xlu1 %644 }
 0x1f7   : > { %v663_v18 = vmul.f32 %v1935_v54, %v645_v8 }
 0x1f9   : > { %v1956_v23 = vsub.f32 %v632_v21, %v663_v18  ;;  %v834_v21 = vld [vmem:[%s1632_s22 + $0x38] sm:$0xff] }
 0x1fb   : > { %v679_v9 = vmul.f32 %v1956_v23, %v1956_v23 }
 0x1fd   : > { %691 = vadd.xlane.f32.xlu2 %v679_v9 }
 0x1fe   : > { %v647_v10 = vpop.xlane.xlu1 %646 }
 0x1ff   : > { %v664_v5 = vmul.f32 %v1935_v54, %v647_v10 }
 0x201   : > { %v1961_v11 = vsub.f32 %v633_v34, %v664_v5  ;;  %v1983_v34 = vsub.f32 %v1877_v22, %v659_v33 }
 0x203   : > { %v680_v12 = vmul.f32 %v1961_v11, %v1961_v11  ;;  %v675_v35 = vmul.f32 %v1983_v34, %v1983_v34 }
 0x205   : > { %693 = vadd.xlane.f32.xlu1 %v680_v12 }
 0x206   : > { %v649_v13 = vpop.xlane.xlu0 %648 }
 0x207   : > { %v665_v14 = vmul.f32 %v1935_v54, %v649_v13 }
 0x209   : > { %v1966_v16 = vsub.f32 %v634_v39, %v665_v14  ;;  %v989_v39 = vsel %vm981_vm9, %v1923_v28, 0.0 }
 0x20b   : > { %v681_v20 = vmul.f32 %v1966_v16, %v1966_v16 }
 0x20d   : > { %695 = vadd.xlane.f32.xlu0 %v681_v20 }
 0x20e   : > { %v651_v26 = vpop.xlane.xlu0 %650 }
 0x20f   : > { %v666_v27 = vmul.f32 %v1935_v54, %v651_v26 }
 0x211   : > { %v1977_v29 = vsub.f32 %v635_v44, %v666_v27 }
 0x213   : > { %v682_v41 = vmul.f32 %v1977_v29, %v1977_v29 }
 0x215   : > { %890 = vrot.lane.b32.xlu2 %v834_v21, %s1545_s14 }
 0x21e   : > { %866 = vrot.lane.b32.xlu1 %v834_v21, %s1546_s15 }
 0x221   : > { %971 = vperm.xlu0 %1395, %v841_v51  }
 0x226   : > { %914 = vrot.lane.b32.xlu1 %v834_v21, %s1544_s13 }
 0x22e   : > { %974 = vperm.xlu1 %1396, %v842_v24  }
 0x23e   : > { %697 = vadd.xlane.f32.xlu2 %v682_v41 }
 0x24b   : > { %683 = vadd.xlane.f32.xlu0 %v675_v35 }
 0x258   : > { %v686_v38 = vpop.xlane.xlu2 %685 }
 0x260   : > { %v688_v36 = vpop.xlane.xlu1 %687 }
 0x261   : > { %v701_v32 = vmul.f32 %v688_v36, %v1935_v54 }
 0x267   : > { %1008 = vxpose.xlu2.b32.start [1/8] (short) %v1866_v3, 128  ;;  %v931_v3 = vsel %vm924_vm0, %v1837_v47, %v1933_v31 }
 0x268   : > { %v690_v25 = vpop.xlane.xlu0 %689 }
 0x269   : > { %v702_v31 = vmul.f32 %v690_v25, %v1935_v54 }
 0x26b   : > { %v2021_v62 = vadd.f32 1e-05, %v702_v31 }
 0x26f   : > { %1009 = vxpose.xlu2.b32.cont [2/8] (short) %v1874_v15, 128 }
 0x270   : > { %v692_v58 = vpop.xlane.xlu2 %691 }
 0x271   : > { %v703_v55 = vmul.f32 %v692_v58, %v1935_v54 }
 0x273   : > { %v2016_v59 = vadd.f32 1e-05, %v703_v55 }
 0x275   : > { %vm761_vm5 = vweird.f32 %v2016_v59 }
 0x277   : > { %1010 = vxpose.xlu2.b32.cont [3/8] (short) %v1886_v17, 128  ;;  %v940_v17 = vsel %vm933_vm1, %v931_v3, %v1929_v48 }
 0x278   : > { %v694_v37 = vpop.xlane.xlu1 %693  ;;  %v891_v47 = vpop.permute.xlu2 %890 }
 0x279   : > { %v704_v46 = vmul.f32 %v694_v37, %v1935_v54 }
 0x27b   : > { %v2013_v56 = vadd.f32 1e-05, %v704_v46 }
 0x27f   : > { %1011 = vxpose.xlu2.b32.cont [4/8] (short) %v1905_v19, 128 }
 0x280   : > { %v696_v22 = vpop.xlane.xlu0 %695 }
 0x281   : > { %v705_v44 = vmul.f32 %v696_v22, %v1935_v54 }
 0x283   : > { %v2010_v52 = vadd.f32 1e-05, %v705_v44 }
 0x285   : > { %1436 = vrsqrt.f32 %v2010_v52  ;;  %vm781_vm14 = vweird.f32 %v2010_v52 }
 0x286   : > { %1438 = vrsqrt.f32 %v2013_v56 }
 0x287   : > { %1012 = vxpose.xlu2.b32.cont [5/8] (short) %v1913_v7, 128  ;;  %v949_v7 = vsel %vm942_vm2, %v940_v17, %v1931_v50  ;;  %v700_v50 = vmul.f32 %v686_v38, %v1935_v54  ;;  %1440 = vrsqrt.f32 %v2016_v59 }
 0x289   : > { %v2018_v60 = vadd.f32 1e-05, %v700_v50  ;;  %v992_v50 = vld [vmem:[#allocation5] sm:$0xff] }
 0x28b   : > { %1442 = vrsqrt.f32 %v2018_v60  ;;  %v2029_v6 = vpop.eup %1436 }
 0x28c   : > { %1444 = vrsqrt.f32 %v2021_v62  ;;  %v2032_v0 = vpop.eup %1438  ;;  %v776_v2 = vmul.f32 %v2029_v6, %v2010_v52  ;;  %vm782_vm12 = vweird.f32 %v2029_v6 }
 0x28d   : > { %v2034_v1 = vpop.eup %1440  ;;  %v766_v8 = vmul.f32 %v2032_v0, %v2013_v56  ;;  %vm772_vm13 = vweird.f32 %v2032_v0 }
 0x28e   : > { %v756_v9 = vmul.f32 %v2034_v1, %v2016_v59  ;;  %v777_v12 = vmul.f32 %v2029_v6, %v776_v2  ;;  %vm762_vm15 = vweird.f32 %v2034_v1 }
 0x28f   : > { %1013 = vxpose.xlu2.b32.cont [6/8] (short) %v989_v39, 128  ;;  %vm2089_vm7 = vmor %vm761_vm5, %vm762_vm15 }
 0x290   : > { %v867_v15 = vpop.permute.xlu1 %866  ;;  %v757_v24 = vmul.f32 %v2034_v1, %v756_v9  ;;  %v778_v26 = vmul.f32 0.5, %v777_v12  ;;  %v1401_v12 = vld [vmem:[#allocation2] ss:$0 sm:$0xff] }
 0x291   : > { %v932_v28 = vsel %vm924_vm0, %v834_v21, %v867_v15  ;;  %v2038_v40 = vpop.eup %1442  ;;  %v767_v21 = vmul.f32 %v2032_v0, %v766_v8  ;;  %vm771_vm0 = vweird.f32 %v2013_v56 }
 0x292   : > { %v941_v30 = vsel %vm933_vm1, %v932_v28, %v891_v47  ;;  %v2040_v45 = vpop.eup %1444  ;;  %v726_v13 = vmul.f32 %v2038_v40, %v2018_v60  ;;  %v758_v36 = vmul.f32 0.5, %v757_v24  ;;  %v779_v25 = vsub.f32 1.5, %v778_v26  ;;  %vm2084_vm6 = vmor %vm771_vm0, %vm772_vm13 }
 0x293   : > { %v972_v19 = vpop.permute.xlu0 %971  ;;  %v746_v14 = vmul.f32 %v2040_v45, %v2021_v62  ;;  %v768_v33 = vmul.f32 0.5, %v767_v21  ;;  %vm752_vm4 = vweird.f32 %v2040_v45  ;;  %vm732_vm9 = vweird.f32 %v2038_v40 }
 0x294   : > { %vm982_vm10 = vcmp.eq.s32.totalorder %v1861_v61, %v972_v19  ;;  %v727_v27 = vmul.f32 %v2038_v40, %v726_v13  ;;  %v759_v17 = vsub.f32 1.5, %v758_v36  ;;  %vm731_vm13 = vweird.f32 %v2018_v60 }
 0x295   : > { %v990_v42 = vsel %vm982_vm10, %v949_v7, 0.0  ;;  %v747_v41 = vmul.f32 %v2040_v45, %v746_v14  ;;  %v769_v39 = vsub.f32 1.5, %v768_v33  ;;  %v780_v7 = vmul.f32 %v2029_v6, %v779_v25  ;;  %vm2117_vm15 = vmor %vm731_vm13, %vm732_vm9 }
 0x296   : > { %v728_v22 = vmul.f32 0.5, %v727_v27 }
 0x297   : > { %1014 = vxpose.xlu2.b32.cont [7/8] (short) %v990_v42, 128  ;;  %v748_v38 = vmul.f32 0.5, %v747_v41  ;;  %v770_v44 = vmul.f32 %v2032_v0, %v769_v39 }
 0x298   : > { %v915_v43 = vpop.permute.xlu1 %914 }
 0x299   : > { %v950_v49 = vsel %vm942_vm2, %v941_v30, %v915_v43  ;;  %v729_v43 = vsub.f32 1.5, %v728_v22  ;;  %v749_v28 = vsub.f32 1.5, %v748_v38  ;;  %vm2072_vm2 = vmor %vm781_vm14, %vm782_vm12  ;;  %v774_v56 = vsel %vm2084_vm6, %v2032_v0, %v770_v44 }
 0x29a   : > { %vm751_vm12 = vweird.f32 %v2021_v62  ;;  %v800_v62 = vmul.f32 %v774_v56, %v1961_v11 }
 0x29b   : > { %v750_v52 = vmul.f32 %v2040_v45, %v749_v28  ;;  %vm2108_vm14 = vmor %vm751_vm12, %vm752_vm4 }
 0x29d   : > { %v754_v60 = vsel %vm2108_vm14, %v2040_v45, %v750_v52 }
 0x29e   : > { %v798_v24 = vmul.f32 %v754_v60, %v1951_v4 }
 0x2a0   : > { %v975_v48 = vpop.permute.xlu1 %974 }
 0x2a1   : > { %vm983_vm11 = vcmp.eq.s32.totalorder %v1861_v61, %v975_v48  ;;  %v2024_v61 = vadd.f32 1e-05, %v701_v32  ;;  %v760_v48 = vmul.f32 %v2034_v1, %v759_v17  ;;  %v730_v32 = vmul.f32 %v2038_v40, %v729_v43 }
 0x2a2   : > { %v991_v53 = vsel %vm983_vm11, %v950_v49, 0.0  ;;  %v784_v49 = vsel %vm2072_vm2, %v2029_v6, %v780_v7 }
 0x2a3   : > { %1015 = vxpose.xlu2.b32.end [8/8] (short) %v991_v53, 128  ;;  %1446 = vrsqrt.f32 %v2024_v61  ;;  %v801_v59 = vmul.f32 %v784_v49, %v1966_v16  ;;  %v764_v8 = vsel %vm2089_vm7, %v2034_v1, %v760_v48  ;;  %v1400_v16 = vld [vmem:[%s2180_s6] ss:$0 sm:$0xff]  ;;  %vm741_vm0 = vweird.f32 %v2024_v61 }
 0x2a4   : > { %v799_v14 = vmul.f32 %v764_v8, %v1956_v23  ;;  %v734_v45 = vsel %vm2117_vm15, %v2038_v40, %v730_v32  ;;  %v810_v40 = vmul.f32 %v1400_v16, %v798_v24  ;;  %v995_v8 = vld [vmem:[#allocation5 + $0x18] sm:$0xff] }
 0x2a5   : > { %v813_v13 = vmul.f32 %v1400_v16, %v801_v59  ;;  %v796_v33 = vmul.f32 %v734_v45, %v1939_v57  ;;  %v994_v59 = vld [vmem:[#allocation5 + $0x10] sm:$0xff]  ;;  %v1000_v45 = vld [vmem:[#allocation5 + $0x40] sm:$0xff] }
 0x2a6   : > { %v811_v41 = vmul.f32 %v1400_v16, %v799_v14 }
 0x2a7   : > { %v825_v27 = vadd.f32 %v1401_v12, %v813_v13  ;;  %v999_v13 = vld [vmem:[#allocation5 + $0x38] sm:$0xff] }
 0x2a8   : > { %v823_v4 = vadd.f32 %v1401_v12, %v811_v41 }
 0x2a9   : > { %v2047_v5 = vpop.eup %1446 }
 0x2aa   : > { %v736_v51 = vmul.f32 %v2047_v5, %v2024_v61  ;;  %vm742_vm10 = vweird.f32 %v2047_v5 }
 0x2ab   : > { %vm2127_vm2 = vmor %vm741_vm0, %vm742_vm10 }
 0x2ac   : > { %v737_v35 = vmul.f32 %v2047_v5, %v736_v51  ;;  %v812_v51 = vmul.f32 %v1400_v16, %v800_v62 }
 0x2ae   : > { %v738_v15 = vmul.f32 0.5, %v737_v35 }
 0x2b0   : > { %v739_v30 = vsub.f32 1.5, %v738_v15 }
 0x2b1   : > { %v698_v18 = vpop.xlane.xlu2 %697 }
 0x2b2   : > { %v706_v10 = vmul.f32 %v698_v18, %v1935_v54  ;;  %v740_v6 = vmul.f32 %v2047_v5, %v739_v30 }
 0x2b4   : > { %v714_v20 = vadd.f32 1e-05, %v706_v10  ;;  %v744_v61 = vsel %vm2127_vm2, %v2047_v5, %v740_v6  ;;  %v824_v5 = vadd.f32 %v1401_v12, %v812_v51  ;;  %v997_v10 = vld [vmem:[#allocation5 + $0x28] sm:$0xff] }
 0x2b5   : > { %v797_v23 = vmul.f32 %v744_v61, %v1945_v63  ;;  %v808_v63 = vmul.f32 %v1400_v16, %v796_v33  ;;  %v1001_v51 = vld [vmem:[#allocation5 + $0x48] sm:$0xff]  ;;  %v1003_v33 = vld [vmem:[#allocation5 + $0x58] sm:$0xff] }
 0x2b6   : > { %1448 = vrsqrt.f32 %v714_v20  ;;  %vm791_vm8 = vweird.f32 %v714_v20 }
 0x2b7   : > { %v809_v25 = vmul.f32 %v1400_v16, %v797_v23 }
 0x2b9   : > { %v821_v38 = vadd.f32 %v1401_v12, %v809_v25  ;;  %v1005_v25 = vld [vmem:[#allocation5 + $0x68] sm:$0xff] }
 0x2bc   : > { %v1449_v37 = vpop.eup %1448 }
 0x2bd   : > { %v786_v3 = vmul.f32 %v1449_v37, %v714_v20  ;;  %vm792_vm3 = vweird.f32 %v1449_v37 }
 0x2be   : > { %v684_v19 = vpop.xlane.xlu0 %683  ;;  %vm793_vm11 = vmor %vm791_vm8, %vm792_vm3 }
 0x2bf   : > { %v787_v58 = vmul.f32 %v1449_v37, %v786_v3  ;;  %v699_v42 = vmul.f32 %v684_v19, %v1935_v54  ;;  %v820_v3 = vadd.f32 %v1401_v12, %v808_v63 }
 0x2c1   : > { %v788_v47 = vmul.f32 0.5, %v787_v58  ;;  %v2067_v46 = vadd.f32 1e-05, %v699_v42 }
 0x2c3   : > { %v789_v55 = vsub.f32 1.5, %v788_v47  ;;  %1450 = vrsqrt.f32 %v2067_v46  ;;  %vm721_vm4 = vweird.f32 %v2067_v46 }
 0x2c5   : > { %v790_v31 = vmul.f32 %v1449_v37, %v789_v55 }
 0x2c7   : > { %v794_v2 = vsel %vm793_vm11, %v1449_v37, %v790_v31  ;;  %v822_v37 = vadd.f32 %v1401_v12, %v810_v40  ;;  %v993_v31 = vld [vmem:[#allocation5 + $0x8] sm:$0xff]  ;;  %v1004_v40 = vld [vmem:[#allocation5 + $0x60] sm:$0xff] }
 0x2c8   : > { %v802_v18 = vmul.f32 %v794_v2, %v1977_v29 }
 0x2c9   : > { %v1451_v9 = vpop.eup %1450 }
 0x2ca   : > { %v716_v1 = vmul.f32 %v1451_v9, %v2067_v46  ;;  %v814_v11 = vmul.f32 %v1400_v16, %v802_v18  ;;  %vm722_vm3 = vweird.f32 %v1451_v9 }
 0x2cb   : > { %vm723_vm5 = vmor %vm721_vm4, %vm722_vm3 }
 0x2cc   : > { %v717_v20 = vmul.f32 %v1451_v9, %v716_v1  ;;  %v826_v21 = vadd.f32 %v1401_v12, %v814_v11  ;;  %v998_v1 = vld [vmem:[#allocation5 + $0x30] sm:$0xff] }
 0x2ce   : > { %v718_v26 = vmul.f32 0.5, %v717_v20  ;;  %1096 = vmatpush.msra.mxu2 %v826_v21  ;;  %1335 = vmatpush.msra.mxu3 %v826_v21 }
 0x2d0   : > { %v719_v35 = vsub.f32 1.5, %v718_v26  ;;  %1097 = vmatpush.msra.mxu2 %v825_v27  ;;  %1336 = vmatpush.msra.mxu3 %v825_v27  ;;  %v1002_v27 = vld [vmem:[#allocation5 + $0x50] sm:$0xff] }
 0x2d2   : > { %v720_v36 = vmul.f32 %v1451_v9, %v719_v35  ;;  %1098 = vmatpush.msra.mxu2 %v824_v5  ;;  %1337 = vmatpush.msra.mxu3 %v824_v5 }
 0x2d4   : > { %1099 = vmatpush.msra.mxu2 %v823_v4  ;;  %1338 = vmatpush.msra.mxu3 %v823_v4  ;;  %v724_v22 = vsel %vm723_vm5, %v1451_v9, %v720_v36 }
 0x2d5   : > { %v795_v57 = vmul.f32 %v724_v22, %v1983_v34  ;;  %v1006_v22 = vld [vmem:[#allocation5 + $0x70] sm:$0xff] }
 0x2d6   : > { %1100 = vmatpush.msra.mxu2 %v822_v37  ;;  %1339 = vmatpush.msra.mxu3 %v822_v37 }
 0x2d7   : > { %v807_v39 = vmul.f32 %v1400_v16, %v795_v57  ;;  %v996_v16 = vld [vmem:[#allocation5 + $0x20] sm:$0xff] }
 0x2d8   : > { %1101 = vmatpush.msra.mxu2 %v821_v38  ;;  %1340 = vmatpush.msra.mxu3 %v821_v38 }
 0x2d9   : > { %v819_v15 = vadd.f32 %v1401_v12, %v807_v39  ;;  %v1007_v39 = vld [vmem:[#allocation5 + $0x78] sm:$0xff] }
 0x2da   : > { %1102 = vmatpush.msra.mxu2 %v820_v3  ;;  %1341 = vmatpush.msra.mxu3 %v820_v3 }
 0x2dc   : > { %1103 = vmatpush.msra.mxu2 %v819_v15  ;;  %1342 = vmatpush.msra.mxu3 %v819_v15 }
 0x304   : > { %v1024_v17 = vpop.trf.xlu2 }
 0x305   : > { %1315 = vmatmul.msk.f32.vlgmr.msra.gmra.mxu2 %vm933_vm1, %v1024_v17 }
 0x30c   : > { %v1025_v19 = vpop.trf.xlu2 }
 0x30d   : > { %1316 = vmatmul.msk.f32.gmra.mxu2 %vm933_vm1, %v1025_v19 }
 0x314   : > { %v1026_v7 = vpop.trf.xlu2 }
 0x315   : > { %1317 = vmatmul.msk.f32.gmra.mxu2 %vm933_vm1, %v1026_v7 }
 0x31c   : > { %v1027_v34 = vpop.trf.xlu2 }
 0x31d   : > { %1318 = vmatmul.msk.f32.gmra.mxu2 %vm933_vm1, %v1027_v34 }
 0x324   : > { %v1028_v58 = vpop.trf.xlu2 }
 0x325   : > { %1319 = vmatmul.msk.f32.gmra.mxu2 %vm933_vm1, %v1028_v58 }
 0x32c   : > { %v1029_v42 = vpop.trf.xlu2 }
 0x32d   : > { %1320 = vmatmul.msk.f32.gmra.mxu2 %vm933_vm1, %v1029_v42 }
 0x334   : > { %v1030_v43 = vpop.trf.xlu2 }
 0x335   : > { %1321 = vmatmul.msk.f32.gmra.mxu2 %vm933_vm1, %v1030_v43 }
 0x33c   : > { %v1031_v28 = vpop.trf.xlu2 }
 0x33d   : > { %1322 = vmatmul.msk.f32.gmra.mxu2 %vm933_vm1, %v1031_v28 }
 0x344   : > { %v1032_v44 = vpop.trf.xlu2 }
 0x345   : > { %1323 = vmatmul.msk.f32.gmra.mxu2 %vm933_vm1, %v1032_v44 }
 0x34c   : > { %v1033_v47 = vpop.trf.xlu2 }
 0x34d   : > { %1324 = vmatmul.msk.f32.vlgmr.msra.gmra.mxu3 %vm933_vm1, %v1033_v47 }
 0x354   : > { %v1034_v46 = vpop.trf.xlu2 }
 0x355   : > { %1325 = vmatmul.msk.f32.gmra.mxu3 %vm933_vm1, %v1034_v46 }
 0x35c   : > { %v1035_v30 = vpop.trf.xlu2 }
 0x35d   : > { %1326 = vmatmul.msk.f32.gmra.mxu3 %vm933_vm1, %v1035_v30 }
 0x364   : > { %v1036_v48 = vpop.trf.xlu2 }
 0x365   : > { %1327 = vmatmul.msk.f32.gmra.mxu3 %vm933_vm1, %v1036_v48 }
 0x36c   : > { %v1037_v54 = vpop.trf.xlu2 }
 0x36d   : > { %1328 = vmatmul.msk.f32.gmra.mxu3 %vm933_vm1, %v1037_v54 }
 0x374   : > { %v1038_v55 = vpop.trf.xlu2 }
 0x375   : > { %1329 = vmatmul.msk.f32.gmra.mxu3 %vm933_vm1, %v1038_v55 }
 0x37c   : > { %v1039_v49 = vpop.trf.xlu2 }
 0x37d   : > { %1330 = vmatmul.msk.f32.gmra.mxu3 %vm933_vm1, %v1039_v49 }
 0x388   : > { %v1105_v52 = vpop.f32.mrf.mxu2 }
 0x389   : > { %v1153_v53 = vadd.f32 %v1105_v52, %v992_v50 }
 0x38b   : > { %1169 = vst [vmem:[#allocation5] sm:$0xff] %v1153_v53 }
 0x390   : > { %v1108_v56 = vpop.f32.mrf.mxu2 }
 0x391   : > { %v1154_v32 = vadd.f32 %v1108_v56, %v993_v31 }
 0x393   : > { %1170 = vst [vmem:[#allocation5 + $0x8] sm:$0xff] %v1154_v32 }
 0x398   : > { %v1111_v6 = vpop.f32.mrf.mxu2 }
 0x399   : > { %v1155_v2 = vadd.f32 %v1111_v6, %v994_v59 }
 0x39b   : > { %1171 = vst [vmem:[#allocation5 + $0x10] sm:$0xff] %v1155_v2 }
 0x3a0   : > { %v1114_v0 = vpop.f32.mrf.mxu2 }
 0x3a1   : > { %v1156_v18 = vadd.f32 %v1114_v0, %v995_v8 }
 0x3a3   : > { %1172 = vst [vmem:[#allocation5 + $0x18] sm:$0xff] %v1156_v18 }
 0x3a8   : > { %v1117_v62 = vpop.f32.mrf.mxu2 }
 0x3a9   : > { %v1157_v9 = vadd.f32 %v1117_v62, %v996_v16 }
 0x3ab   : > { %1173 = vst [vmem:[#allocation5 + $0x20] sm:$0xff] %v1157_v9 }
 0x3b0   : > { %v1120_v60 = vpop.f32.mrf.mxu2 }
 0x3b1   : > { %v1158_v29 = vadd.f32 %v1120_v60, %v997_v10 }
 0x3b3   : > { %1174 = vst [vmem:[#allocation5 + $0x28] sm:$0xff] %v1158_v29 }
 0x3b8   : > { %v1123_v11 = vpop.f32.mrf.mxu2 }
 0x3b9   : > { %v1159_v12 = vadd.f32 %v1123_v11, %v998_v1 }
 0x3bb   : > { %1175 = vst [vmem:[#allocation5 + $0x30] sm:$0xff] %v1159_v12 }
 0x3c0   : > { %v1126_v14 = vpop.f32.mrf.mxu2 }
 0x3c1   : > { %v1160_v61 = vadd.f32 %v1126_v14, %v999_v13 }
 0x3c3   : > { %1176 = vst [vmem:[#allocation5 + $0x38] sm:$0xff] %v1160_v61 }
 0x3c8   : > { %v1129_v20 = vpop.f32.mrf.mxu2 }
 0x3c9   : > { %v1161_v21 = vadd.f32 %v1129_v20, %v1000_v45 }
 0x3cb   : > { %1177 = vst [vmem:[#allocation5 + $0x40] sm:$0xff] %v1161_v21 }
 0x3d0   : > { %v1132_v24 = vpop.f32.mrf.mxu3 }
 0x3d1   : > { %v1162_v26 = vadd.f32 %v1132_v24, %v1001_v51 }
 0x3d3   : > { %1178 = vst [vmem:[#allocation5 + $0x48] sm:$0xff] %v1162_v26 }
 0x3d8   : > { %v1135_v41 = vpop.f32.mrf.mxu3 }
 0x3d9   : > { %v1163_v23 = vadd.f32 %v1135_v41, %v1002_v27 }
 0x3db   : > { %1179 = vst [vmem:[#allocation5 + $0x50] sm:$0xff] %v1163_v23 }
 0x3e0   : > { %v1138_v35 = vpop.f32.mrf.mxu3 }
 0x3e1   : > { %v1164_v5 = vadd.f32 %v1138_v35, %v1003_v33 }
 0x3e3   : > { %1180 = vst [vmem:[#allocation5 + $0x58] sm:$0xff] %v1164_v5 }
 0x3e8   : > { %v1141_v36 = vpop.f32.mrf.mxu3 }
 0x3e9   : > { %v1165_v4 = vadd.f32 %v1141_v36, %v1004_v40 }
 0x3eb   : > { %1181 = vst [vmem:[#allocation5 + $0x60] sm:$0xff] %v1165_v4 }
 0x3f0   : > { %v1144_v37 = vpop.f32.mrf.mxu3 }
 0x3f1   : > { %v1166_v63 = vadd.f32 %v1144_v37, %v1005_v25 }
 0x3f3   : > { %1182 = vst [vmem:[#allocation5 + $0x68] sm:$0xff] %v1166_v63 }
 0x3f8   : > { %v1147_v57 = vpop.f32.mrf.mxu3 }
 0x3f9   : > { %v1167_v38 = vadd.f32 %v1147_v57, %v1006_v22 }
 0x3fb   : > { %1183 = vst [vmem:[#allocation5 + $0x70] sm:$0xff] %v1167_v38 }
 0x400   : > { %v1150_v3 = vpop.f32.mrf.mxu3 }
 0x401   : > { %v1168_v15 = vadd.f32 %v1150_v3, %v1007_v39 }
 0x403   : > { %1184 = vst [vmem:[#allocation5 + $0x78] sm:$0xff] %v1168_v15 }
 0x404   : > { %1348 = dma.vmem_to_hbm [thread:$0]  (%p1357_p9), %s1194_s21, 2048, %s1196_s26, [#allocation4], %s1550_s27, %s1550_s27, %s1551_s10  }
 0x405   : > { %1527 = dma.done.wait (%p1357_p9), [#allocation4], 2048  }
 0x406   : > { %1529 = vsyncadd (%p1357_p9), [#allocation4], 4294965248 }
 0x407 PF: > { %s20_s29 = sadd.s32 1, %s1540_s29   ;;  %s2195_s27 = smov %s1536_s28 }
 0x408   : > { %p17_p10 = scmp.ge.s32.totalorder %s20_s29, 5   ;;  %s2196_s28 = smov %s2198_s9 }
 0x40a   :  { %19 = sbr.rel (!%p17_p10) target bundleno = 3 (0x3), region = 97 }
 0x40f   :  { %1212 = vsyncpa [#allocation3], 1 }
 0x410   :  { %1214 = vsyncpa [#allocation3 + $0x1], 1 }
 0x411   :  { %1215 = vsyncpa [#allocation4], 1 }
 0x412   :  { %1217 = vsyncpa [#allocation4 + $0x1], 1 }

</bundles_post_ra>
